<compile_context>
chip_gen: v6e
topology: v6e:2x2x1
jax: 0.10.0
libtpu: 0.0.40
codegen_flags: <defaults>
</compile_context>

<pallas_src>
import jax
import jax.numpy as jnp
from jax.experimental import pallas as pl
from jax.experimental.pallas import tpu as pltpu


def _round_up(x, m):
    return (x + m - 1) // m * m


def linear_seft_kernel(x_ref, pw_ref, wh_ref, bh_ref, wg_ref, out_ref):
    TB, Tp, F = x_ref.shape
    Fp = wh_ref.shape[1]

    # h(x) = relu(x @ Wh^T + bh): flatten rows so the MXU sees one (TB*Tp, F) x (F, Fp)
    # matmul. Tp is aligned to the (packed) sublane tile, so the reshape is layout-free.
    x2 = x_ref[...].reshape(TB * Tp, F)
    hx = jnp.dot(x2, wh_ref[...], preferred_element_type=jnp.float32)
    hx = jnp.maximum(hx + bh_ref[...], 0.0).reshape(TB, Tp, Fp)      # f32

    # seq_avg_pooling: pooling weights = onehot / count(new_onehot) were folded into pw
    # in the wrapper (shape (TB, Tp, 1)), so the masked mean over time is a VPU
    # lane-broadcast multiply + XLU sublane reduce -- no M=1 matmul through the MXU,
    # no in-kernel iota/where/divide.
    pooled = jnp.sum(hx * pw_ref[...], axis=1)                       # (TB, Fp) f32

    # g(pooled) = pooled @ Wg^T (no bias); output lane dim Fp is 128-dense.
    out_ref[...] = jnp.dot(pooled.astype(wg_ref.dtype), wg_ref[...],
                           preferred_element_type=jnp.float32).astype(out_ref.dtype)


def _per_row_vmem_bytes(Tp, F, Fp, itemsize):
    """Estimated VMEM bytes per batch row across the pipeline."""
    return (2 * Tp * F * itemsize          # x block (double-buffered)
            + 2 * Tp * 128 * 4             # pw block: (Tp,1) lane-pads to 128 in VMEM, 2 bufs
            + 2 * Tp * Fp * 4              # f32 hx + elementwise temps (headroom x2)
            + 2 * Fp * 4 + Fp * itemsize)  # out block (double-buffered) + pooled cast


def _fixed_vmem_bytes(Fp, itemsize):
    # 2 resident Fp x Fp weights, (conservatively) double-buffered, + f32 bias x2.
    return 2 * 2 * Fp * Fp * itemsize + 2 * Fp * 4


def _choose_batch_tile(B, Tp, F, Fp, itemsize, total_budget_bytes=36 << 20):
    """Largest multiple-of-8 batch tile fitting a ~36 MiB total VMEM budget (safe on
    v7x's 64 MiB/TC with an explicit vmem_limit), capped so the grid keeps >= 2 steps
    when the batch allows it (v7x megacore balance)."""
    per_row = _per_row_vmem_bytes(Tp, F, Fp, itemsize)
    fixed = _fixed_vmem_bytes(Fp, itemsize)
    avail = max(total_budget_bytes - fixed, 8 * per_row)
    tb = max(8, (avail // per_row) // 8 * 8)
    cap = _round_up(-(-B // 2), 8) if B > 8 else _round_up(B, 8)
    return int(min(tb, cap))


def linear_seft(x, onehot, wh_t, bh, wg_t, *, batch_tile=None,
                compute_dtype=jnp.bfloat16, interpret=False):
    """
    x:      (B, T, F) float32
    onehot: (B, T)    bool
    wh_t:   (F, F)    = Wh^T  (h: Linear(F, F, bias=True),  pre-transposed to (in, out))
    bh:     (F,)      float32
    wg_t:   (F, F)    = Wg^T  (g: Linear(F, F, bias=False), pre-transposed to (in, out))
    Returns (B, F) float32.
    compute_dtype: matmul operand dtype (bf16 default: MXU-native on v5e/v6e/v7x,
    halves HBM traffic; accumulation / bias / ReLU / pooling stay f32).
    """
    B, T, F = x.shape
    f32 = jnp.float32
    cd = jnp.dtype(compute_dtype)
    itemsize = cd.itemsize

    # ---- Pooling weights computed exactly in f32 in the wrapper ----
    mask = onehot.astype(f32)
    new_mask = mask.at[:, 0].set(1.0)                      # t=0 forced True (denominator)
    denom = jnp.sum(new_mask, axis=1, keepdims=True)       # >= 1, no div-by-zero
    pool_w = mask / denom                                  # (B, T)

    # ---- TPU-friendly shapes (zero padding is exact) ----
    Fp = max(128, _round_up(F, 128))                       # lane-dense *output* feature dim
    t_align = 8 * (4 // itemsize)                          # 8 (f32) / 16 (bf16 packed sublanes)
    Tp = _round_up(T, t_align)                             # keeps the in-kernel reshape free

    if batch_tile is None:
        TB = _choose_batch_tile(B, Tp, F, Fp, itemsize)
    else:
        TB = max(8, _round_up(int(batch_tile), 8))
    Bp = _round_up(B, TB)

    # Only the small T/B pads touch x; the true F stays as the full-extent last dim
    # (no 4x lane inflation of the dominant HBM stream).
    xp = jnp.zeros((Bp, Tp, F), cd).at[:B, :T, :].set(x.astype(cd))
    pwp = jnp.zeros((Bp, Tp, 1), f32).at[:B, :T, 0].set(pool_w)
    whp = jnp.zeros((F, Fp), cd).at[:, :F].set(wh_t.astype(cd))    # pad output dim only
    bhp = jnp.zeros((1, Fp), f32).at[0, :F].set(bh.astype(f32))
    wgp = jnp.zeros((Fp, Fp), cd).at[:F, :F].set(wg_t.astype(cd))

    est = _fixed_vmem_bytes(Fp, itemsize) + _per_row_vmem_bytes(Tp, F, Fp, itemsize) * TB
    vmem_limit = int(min(max(2 * est, 32 << 20), 56 << 20))   # < v7x 64 MiB/TC physical

    grid = (Bp // TB,)
    out = pl.pallas_call(
        linear_seft_kernel,
        out_shape=jax.ShapeDtypeStruct((Bp, Fp), f32),
        grid_spec=pltpu.PrefetchScalarGridSpec(
            num_scalar_prefetch=0,
            grid=grid,
            in_specs=[
                pl.BlockSpec((TB, Tp, F), lambda b: (b, 0, 0)),    # x tile (pipelined)
                pl.BlockSpec((TB, Tp, 1), lambda b: (b, 0, 0)),    # pooling weights tile
                pl.BlockSpec((F, Fp), lambda b: (0, 0)),           # Wh^T (resident)
                pl.BlockSpec((1, Fp), lambda b: (0, 0)),           # bh   (resident)
                pl.BlockSpec((Fp, Fp), lambda b: (0, 0)),          # Wg^T (resident)
            ],
            out_specs=pl.BlockSpec((TB, Fp), lambda b: (b, 0)),
        ),
        compiler_params=pltpu.CompilerParams(
            # Batch tiles are independent -> shard across TensorCores on v7x megacore.
            dimension_semantics=("parallel",),
            vmem_limit_bytes=vmem_limit,
        ),
        interpret=interpret,
    )(xp, pwp, whp, bhp, wgp)

    return out[:B, :F]


def linear_seft_ref(x, onehot, wh_t, bh, wg_t, compute_dtype=jnp.float32):
    """Pure-JAX reference mirroring the PyTorch module (optionally with the same
    bf16-operand / f32-accumulation scheme as the kernel)."""
    xc = x.astype(compute_dtype)
    whc = wh_t.astype(compute_dtype)
    wgc = wg_t.astype(compute_dtype)
    hx = jnp.einsum("btf,fg->btg", xc, whc, preferred_element_type=jnp.float32) + bh
    hx = jnp.maximum(hx, 0.0)
    mask = onehot.astype(jnp.float32)
    new_mask = mask.at[:, 0].set(1.0)
    pooled = jnp.sum(hx * mask[..., None], axis=1) / jnp.sum(new_mask, axis=1, keepdims=True)
    return jnp.einsum("bf,fg->bg", pooled.astype(compute_dtype), wgc,
                      preferred_element_type=jnp.float32)


if __name__ == "__main__":
    # Small but non-trivial shapes: batch padding (13 -> 16, grid of 2 tiles of 8, so
    # both v7x TensorCores get work), time padding (7 -> 16 in bf16 / 8 in f32) and
    # an un-padded true feature dim F=32 as the x block's last dim.
    B, T, F = 13, 7, 32
    key = jax.random.PRNGKey(0)
    kx, km, kwh, kbh, kwg = jax.random.split(key, 5)

    x = jax.random.normal(kx, (B, T, F), dtype=jnp.float32)
    onehot = jax.random.bernoulli(km, 0.6, (B, T))
    onehot = onehot.at[1, 0].set(False)   # exercise the new_onehot (t=0 forced True) path

    # PyTorch Linear stores W as (out, in); weights here are pre-transposed to (in, out).
    wh_t = jax.random.normal(kwh, (F, F), dtype=jnp.float32) * 0.1
    bh = jax.random.normal(kbh, (F,), dtype=jnp.float32) * 0.1
    wg_t = jax.random.normal(kwg, (F, F), dtype=jnp.float32) * 0.1

    # Default path: bf16 matmul operands, f32 accumulation (MXU fast path, half HBM).
    out_bf16 = jax.block_until_ready(linear_seft(x, onehot, wh_t, bh, wg_t))
    ref_bf16 = linear_seft_ref(x, onehot, wh_t, bh, wg_t, compute_dtype=jnp.bfloat16)
    assert out_bf16.shape == (B, F)
    assert jnp.allclose(out_bf16, ref_bf16, atol=3e-2, rtol=3e-2)

    # f32 path: exact match against the reference.
    out_f32 = jax.block_until_ready(
        linear_seft(x, onehot, wh_t, bh, wg_t, compute_dtype=jnp.float32))
    ref_f32 = linear_seft_ref(x, onehot, wh_t, bh, wg_t)
    assert out_f32.shape == (B, F)
    assert jnp.allclose(out_f32, ref_f32, atol=1e-4, rtol=1e-4)

    print("KERNEL_OK")
</pallas_src>

<mosaic_0001>
module attributes {stable_mosaic.version = 11 : i64} {
  func.func @linear_seft_kernel(%arg0: i32, %arg1: memref<8x16x32xbf16, #tpu.memory_space<vmem>>, %arg2: memref<8x16x1xf32, #tpu.memory_space<vmem>>, %arg3: memref<32x128xbf16, #tpu.memory_space<vmem>>, %arg4: memref<1x128xf32, #tpu.memory_space<vmem>>, %arg5: memref<128x128xbf16, #tpu.memory_space<vmem>>, %arg6: memref<8x128xf32, #tpu.memory_space<vmem>>) attributes {dimension_semantics = [#tpu.dimension_semantics<parallel>], iteration_bounds = array<i64: 2>, scalar_prefetch = 0 : i64, scratch_operands = 0 : i64, tpu.core_type = #tpu.core_type<tc>, window_params = [{transform_indices = @transform_0, window_bounds = array<i64: 8, 16, 32>}, {transform_indices = @transform_1, window_bounds = array<i64: 8, 16, 1>}, {pipeline_mode = #tpu.pipeline_mode<synchronous>, transform_indices = @transform_2, window_bounds = array<i64: 32, 128>}, {pipeline_mode = #tpu.pipeline_mode<synchronous>, transform_indices = @transform_3, window_bounds = array<i64: 1, 128>}, {pipeline_mode = #tpu.pipeline_mode<synchronous>, transform_indices = @transform_4, window_bounds = array<i64: 128, 128>}, {transform_indices = @transform_5, window_bounds = array<i64: 8, 128>}]} {
    %c0 = arith.constant 0 : index
    %c0_0 = arith.constant 0 : index
    %c0_1 = arith.constant 0 : index
    %0 = vector.load %arg1[%c0, %c0_0, %c0_1] : memref<8x16x32xbf16, #tpu.memory_space<vmem>>, vector<8x16x32xbf16>
    %1 = vector.shape_cast %0 : vector<8x16x32xbf16> to vector<128x32xbf16>
    %c0_2 = arith.constant 0 : index
    %c0_3 = arith.constant 0 : index
    %2 = vector.load %arg3[%c0_2, %c0_3] : memref<32x128xbf16, #tpu.memory_space<vmem>>, vector<32x128xbf16>
    %cst = arith.constant dense<0.000000e+00> : vector<128x128xf32>
    %3 = tpu.matmul %1, %2, %cst {dimension_numbers = #tpu.dot_dimension_numbers<[1], [0], [0], [1], [0, 0, 1, 1], [], []>} : vector<128x32xbf16>, vector<32x128xbf16>, vector<128x128xf32> -> vector<128x128xf32>
    %c0_4 = arith.constant 0 : index
    %c0_5 = arith.constant 0 : index
    %4 = vector.load %arg4[%c0_4, %c0_5] : memref<1x128xf32, #tpu.memory_space<vmem>>, vector<1x128xf32>
    %5 = vector.broadcast %4 : vector<1x128xf32> to vector<128x128xf32>
    %6 = arith.addf %3, %5 : vector<128x128xf32>
    %cst_6 = arith.constant 0.000000e+00 : f32
    %7 = vector.broadcast %cst_6 : f32 to vector<128x128xf32>
    %8 = arith.maximumf %6, %7 : vector<128x128xf32>
    %9 = vector.shape_cast %8 : vector<128x128xf32> to vector<8x16x128xf32>
    %c0_7 = arith.constant 0 : index
    %c0_8 = arith.constant 0 : index
    %c0_9 = arith.constant 0 : index
    %10 = vector.load %arg2[%c0_7, %c0_8, %c0_9] : memref<8x16x1xf32, #tpu.memory_space<vmem>>, vector<8x16x1xf32>
    %11 = vector.broadcast %10 : vector<8x16x1xf32> to vector<8x16x128xf32>
    %12 = arith.mulf %9, %11 : vector<8x16x128xf32>
    %cst_10 = arith.constant dense<0.000000e+00> : vector<8x128xf32>
    %13 = vector.multi_reduction <add>, %12, %cst_10 [1] : vector<8x16x128xf32> to vector<8x128xf32>
    %14 = arith.truncf %13 : vector<8x128xf32> to vector<8x128xbf16>
    %c0_11 = arith.constant 0 : index
    %c0_12 = arith.constant 0 : index
    %15 = vector.load %arg5[%c0_11, %c0_12] : memref<128x128xbf16, #tpu.memory_space<vmem>>, vector<128x128xbf16>
    %cst_13 = arith.constant dense<0.000000e+00> : vector<8x128xf32>
    %16 = tpu.matmul %14, %15, %cst_13 {dimension_numbers = #tpu.dot_dimension_numbers<[1], [0], [0], [1], [0, 0, 1, 1], [], []>} : vector<8x128xbf16>, vector<128x128xbf16>, vector<8x128xf32> -> vector<8x128xf32>
    %c0_14 = arith.constant 0 : index
    %c0_15 = arith.constant 0 : index
    %17 = vector.load %arg6[%c0_14, %c0_15] : memref<8x128xf32, #tpu.memory_space<vmem>>, vector<8x128xf32>
    tpu.vector_store %arg6[%c0_14, %c0_15], %16 {strides = array<i32>} : memref<8x128xf32, #tpu.memory_space<vmem>>, vector<8x128xf32>,
    return
  }
  func.func @transform_0(%arg0: i32) -> (i32, i32, i32) {
    %c0_i32 = arith.constant 0 : i32
    %c0_i32_0 = arith.constant 0 : i32
    %c0_i32_1 = arith.constant 0 : i32
    return %arg0, %c0_i32, %c0_i32_0 : i32, i32, i32
  }
  func.func @transform_1(%arg0: i32) -> (i32, i32, i32) {
    %c0_i32 = arith.constant 0 : i32
    %c0_i32_0 = arith.constant 0 : i32
    %c0_i32_1 = arith.constant 0 : i32
    return %arg0, %c0_i32, %c0_i32_0 : i32, i32, i32
  }
  func.func @transform_2(%arg0: i32) -> (i32, i32) {
    %c0_i32 = arith.constant 0 : i32
    %c0_i32_0 = arith.constant 0 : i32
    %c0_i32_1 = arith.constant 0 : i32
    return %c0_i32, %c0_i32_0 : i32, i32
  }
  func.func @transform_3(%arg0: i32) -> (i32, i32) {
    %c0_i32 = arith.constant 0 : i32
    %c0_i32_0 = arith.constant 0 : i32
    %c0_i32_1 = arith.constant 0 : i32
    return %c0_i32, %c0_i32_0 : i32, i32
  }
  func.func @transform_4(%arg0: i32) -> (i32, i32) {
    %c0_i32 = arith.constant 0 : i32
    %c0_i32_0 = arith.constant 0 : i32
    %c0_i32_1 = arith.constant 0 : i32
    return %c0_i32, %c0_i32_0 : i32, i32
  }
  func.func @transform_5(%arg0: i32) -> (i32, i32) {
    %c0_i32 = arith.constant 0 : i32
    %c0_i32_0 = arith.constant 0 : i32
    return %arg0, %c0_i32 : i32, i32
  }
}

</mosaic_0001>

<bundles_post_ra>
// kernel: tpu_custom_call.1
= control target key start
LH: loop header
LB: loop body
LE: loop exit
PB: predicated region body
PF: predicated region fallthrough
CT: control target
= control target key end

     0   :  { %10 = vsyncpa [#allocation3], 0  ;;  %s1318_s0 = inlined_call_operand.vmem [shape: bf16[16,16,32], index: 0, kind: input, shape index: {}]   ;;  %s1319_s1 = inlined_call_operand.vmem [shape: f32[16,16,1], index: 1, kind: input, shape index: {}]   ;;  %s1320_s2 = inlined_call_operand.vmem [shape: bf16[32,128], index: 2, kind: input, shape index: {}]   ;;  %s1321_s3 = inlined_call_operand.vmem [shape: f32[1,128], index: 3, kind: input, shape index: {}]   ;;  %s1322_s4 = inlined_call_operand.vmem [shape: bf16[128,128], index: 4, kind: input, shape index: {}]   ;;  %s1323_s5 = inlined_call_operand.hbm [shape: f32[16,128], index: 5, kind: output, shape index: {}]  }
   0x1   :  { %12 = vsyncpa [#allocation3 + $0x1], 0  ;;  %s1130_s18 = smov 0   ;;  %s1132_s19 = smov 0  }
   0x2   :  { %s1134_s20 = smov 0   ;;  %s1136_s21 = smov 0  }
   0x3 LB: > { %s1151_s22 = sadd.s32 4294967295, %s1094_s21   ;;  %s869_s23 = sadd.s32 4294967294, %s1094_s21   ;;  %s1094_s21 = sphi %s1136_s21, %s1329_s21   ;;  %s1090_s20 = sphi %s1134_s20, %s1328_s20   ;;  %s1086_s19 = sphi %s1132_s19, %s1327_s19   ;;  %s1082_s18 = sphi %s1130_s18, %s1326_s18  }
   0x4   : > { %s1155_s24 = sadd.s32 1, %s1094_s21   ;;  %s140_s25 = sadd.s32 1, %s1090_s20 }
   0x5   : > { %s137_s26 = ssub.s32 %s1094_s21, %s1155_s24  ;;  %p150_p0 = scmp.ne.s32.totalorder %s1090_s20, %s1086_s19 }
   0x6   : > { %p138_p1 = scmp.eq.s32.totalorder %s137_s26, 0  ;;  %p151_p2 = scmp.eq.s32.totalorder %s1151_s22, 1 }
   0x7   : > { %p156_p3 = scmp.ne.s32.totalorder %s1086_s19, %s1082_s18  ;;  %p157_p4 = scmp.eq.s32.totalorder %s869_s23, 1 }
   0x8   : > { %s1166_s27 = scalar_select %p138_p1, %s1090_s20, %s140_s25  }
   0x9   : > { %p1168_p5 = por %p151_p2, %p150_p0  ;;  %p1172_p6 = por %p157_p4, %p156_p3 }
   0xa   : > { %p872_p7 = scmp.ge.s32.totalorder %s1094_s21, 1  ;;  %p204_p8 = scmp.lt.s32.totalorder %s1094_s21, 3 }
   0xc   : > { %p205_p9 = pnand %p872_p7, %p204_p8 }
   0xd   : > { %s874_s7 = sshll.u32 (!%p205_p9), %s1151_s22, 3  ;;  %s236_s26 = sand.u32 (!%p205_p9), 1, %s1086_s19  }
   0xe   : > { %208 = sbr.rel (%p205_p9) target bundleno = 489 (0x1e9), region = 40  ;;  %p240_p10 = scmp.lt.s32.totalorder (!%p205_p9), %s874_s7, 15 }
   0xf   : > { %s873_s30 = sshll.u32 (!%p205_p9), %s236_s26, 3  ;;  %s908_s8 = sshll.u32 (!%p205_p9), %s1151_s22, 7 }
  0x10   : > { %s238_s6 = scalar_lea.vmem (!%p205_p9), [#allocation2], %s873_s30  ;;  %s1279_s11 = scalar_lea.hbm (!%p205_p9), %s1323_s5, %s908_s8 }
  0x11   : > { %s785_s12 = scalar_lea.sflag (!%p205_p9), [#allocation3], %s236_s26  ;;  %s1099_s22 = smov (!%p205_p9), [#allocation2]  }
  0x13   : > { %v1016_v0 = vld [vmem:[%s1320_s2 + $0x8] sm:$0xff]   ;;  %v1017_v1 = vld [vmem:[%s1320_s2] sm:$0xff]   ;;  %s1331_s7 = smov (!%p240_p10, %s874_s7), 15  ;;  %v1096_v2 = vmov 0   ;;  %vm333_vm0 = vcmask 261120   ;;  %v1026_v27 = vld [vmem:[%s1322_s4 + $0x38] sm:$0xff]  }
  0x14   : > { %932 = vmatprep.subr.bf16.mxu0 %v1016_v0  ;;  %1015 = vset.pattern.permute.xlu1 %v1096_v2  ;;  %s911_s10 = sshll.u32 %s1331_s7, 3  ;;  %s912_s14 = sshll.u32 %s1331_s7, 4  ;;  %v1097_v28 = vmov 0.0   ;;  %v1027_v29 = vld [vmem:[%s1322_s4 + $0x30] sm:$0xff]   ;;  %v1028_v30 = vld [vmem:[%s1322_s4 + $0x28] sm:$0xff]   ;;  %v1029_v31 = vld [vmem:[%s1322_s4 + $0x20] sm:$0xff]  }
  0x15   : > { %933 = vmatpush3.bf16.msra.mxu0 %v1016_v0  ;;  %1014 = vset.pattern.permute.xlu0 %v1096_v2  ;;  %s1188_s13 = scalar_lea.vmem %s1318_s0, %s911_s10  ;;  %s1199_s17 = scalar_lea.vmem %s1319_s1, %s912_s14  ;;  %v1030_v32 = vld [vmem:[%s1322_s4 + $0x18] sm:$0xff]   ;;  %v1031_v33 = vld [vmem:[%s1322_s4 + $0x10] sm:$0xff]   ;;  %v1032_v34 = vld [vmem:[%s1322_s4 + $0x8] sm:$0xff]   ;;  %vm1098_vm1 = vmmov 0   ;;  %vm679_vm2 = vcmask 1041409   ;;  %vm681_vm3 = vcmask 1042434  }
  0x16   : > { %934 = vmatprep.subr.bf16.mxu0 %v1017_v1  ;;  %v1018_v3 = vld [vmem:[%s1188_s13] sm:$0xff]   ;;  %v1019_v4 = vld [vmem:[%s1188_s13 + $0x8] sm:$0xff]   ;;  %v1020_v5 = vld [vmem:[%s1188_s13 + $0x10] sm:$0xff]   ;;  %952 = vmatprep.subr.bf16.mxu1 %v1097_v28  ;;  %vm683_vm4 = vcmask 1043459   ;;  %vm685_vm5 = vcmask 1044484   ;;  %vm687_vm6 = vcmask 1045509  }
  0x17   : > { %936 = vmatprep.mubr.msk.bf16.mxu0 %vm333_vm0, %v1018_v3  ;;  %v1021_v6 = vld [vmem:[%s1188_s13 + $0x18] sm:$0xff]   ;;  %v1022_v7 = vld [vmem:[%s1188_s13 + $0x20] sm:$0xff]   ;;  %v473_v8 = vld [vmem:[%s1199_s17 + $0x10] sm:$0xff]  ;;  %953 = vmatpush3.bf16.msra.mxu1 %v1026_v27  ;;  %vm689_vm7 = vcmask 1046534   ;;  %vm691_vm8 = vcmask 1047559   ;;  %s798_s7 = sshll.u32 %s238_s6, 4  ;;  %s1274_s7 = int_to_ptr.vmem [resolvable:$true] %s798_s7 }
  0x18   : > { %v471_v9 = vld [vmem:[%s1199_s17] sm:$0xff]  ;;  %499 = vperm.xlu1 %1015, %v473_v8   ;;  %v474_v10 = vld [vmem:[%s1199_s17 + $0x18] sm:$0xff]  ;;  %v472_v11 = vld [vmem:[%s1199_s17 + $0x8] sm:$0xff]  ;;  %954 = vmatprep.subr.bf16.mxu1 %v1097_v28  ;;  %s1038_s14 = sshll.u32 %s1099_s22, 4  ;;  %s1039_s14 = int_to_ptr.vmem [resolvable:$false] %s1038_s14 }
  0x19   : > { %935 = vmatpush3.bf16.msra.mxu0 %v1017_v1  ;;  %489 = vperm.xlu0 %1014, %v471_v9   ;;  %v476_v12 = vld [vmem:[%s1199_s17 + $0x28] sm:$0xff]  ;;  %v475_v13 = vld [vmem:[%s1199_s17 + $0x20] sm:$0xff]  ;;  %v1024_v15 = vld [vmem:[%s1188_s13 + $0x30] sm:$0xff]   ;;  %s1040_s15 = scalar_lea.vmem %s1039_s14, 256  ;;  %p1041_p0 = scmp.lt.s32.totalorder %s1274_s7, %s1039_s14 }
  0x1a   : > { %v1023_v14 = vld [vmem:[%s1188_s13 + $0x28] sm:$0xff]   ;;  %v478_v16 = vld [vmem:[%s1199_s17 + $0x38] sm:$0xff]  ;;  %v477_v17 = vld [vmem:[%s1199_s17 + $0x30] sm:$0xff]  ;;  %968 = vmatprep.mubr.msk.bf16.mxu1 %vm1098_vm1, %v1097_v28 }
  0x1b   : > { %v480_v18 = vld [vmem:[%s1199_s17 + $0x48] sm:$0xff]  ;;  %v479_v19 = vld [vmem:[%s1199_s17 + $0x40] sm:$0xff]  ;;  %v1025_v20 = vld [vmem:[%s1188_s13 + $0x38] sm:$0xff]   ;;  %955 = vmatpush3.bf16.msra.mxu1 %v1027_v29  ;;  %s1034_s13 = scalar_lea.vmem %s1274_s7, 128 }
  0x1c   : > { %937 = vmatmul.mubr.msk.bf16.vlgmr.msra.gmra.mxu0 %vm333_vm0, %v1019_v4  ;;  %504 = vperm.xlu1 %1015, %v474_v10   ;;  %v482_v21 = vld [vmem:[%s1199_s17 + $0x58] sm:$0xff]  ;;  %v481_v22 = vld [vmem:[%s1199_s17 + $0x50] sm:$0xff]  ;;  %v484_v23 = vld [vmem:[%s1199_s17 + $0x68] sm:$0xff]  ;;  %p1035_p11 = scmp.ne.s32.totalorder %s1274_s7, %s1034_s13  ;;  %p1042_p1 = scmp.lt.s32.totalorder %s1040_s15, %s1034_s13 }
  0x1d   : > { %940 = vmatprep.mubr.msk.bf16.mxu0 %vm333_vm0, %v1020_v5  ;;  %494 = vperm.xlu0 %1014, %v472_v11   ;;  %v483_v24 = vld [vmem:[%s1199_s17 + $0x60] sm:$0xff]  ;;  %v486_v25 = vld [vmem:[%s1199_s17 + $0x78] sm:$0xff]  ;;  %v485_v26 = vld [vmem:[%s1199_s17 + $0x70] sm:$0xff] }
  0x1e   : > { %956 = vmatprep.subr.bf16.mxu1 %v1097_v28  ;;  %v1033_v35 = vld [vmem:[%s1322_s4] sm:$0xff]   ;;  %p1036_p12 = pnand %p1035_p11, %p1168_p5  ;;  %p1043_p2 = por %p1042_p1, %p1041_p0 }
  0x1f   : > { %957 = vmatpush3.bf16.msra.mxu1 %v1028_v30  ;;  %v1254_v40 = vld [vmem:[%s1321_s3] ss:$0 sm:$0xff] }
  0x20   : > { %514 = vperm.xlu1 %1015, %v476_v12   ;;  %958 = vmatprep.subr.bf16.mxu1 %v1097_v28  ;;  %p1037_p13 = pneg %p1036_p12 }
  0x21   : > { %509 = vperm.xlu0 %1014, %v475_v13  }
  0x22   : > { %p1044_p3 = pnand %p1043_p2, %p1037_p13 }
  0x23   : > { %959 = vmatpush3.bf16.msra.mxu1 %v1029_v31 }
  0x24   : > { %941 = vmatmul.mubr.msk.bf16.gmra.mxu0 %vm333_vm0, %v1021_v6  ;;  %524 = vperm.xlu1 %1015, %v478_v16  }
  0x25   : > { %944 = vmatprep.mubr.msk.bf16.mxu0 %vm333_vm0, %v1022_v7  ;;  %519 = vperm.xlu0 %1014, %v477_v17  }
  0x26   : > { %960 = vmatprep.subr.bf16.mxu1 %v1097_v28 }
  0x27   : > { %961 = vmatpush3.bf16.msra.mxu1 %v1030_v32 }
  0x28   : > { %534 = vperm.xlu1 %1015, %v480_v18   ;;  %962 = vmatprep.subr.bf16.mxu1 %v1097_v28 }
  0x29   : > { %529 = vperm.xlu0 %1014, %v479_v19  }
  0x2b   : > { %963 = vmatpush3.bf16.msra.mxu1 %v1031_v33 }
  0x2c   : > { %945 = vmatmul.mubr.msk.bf16.gmra.mxu0 %vm333_vm0, %v1023_v14  ;;  %544 = vperm.xlu1 %1015, %v482_v21  }
  0x2d   : > { %948 = vmatprep.mubr.msk.bf16.mxu0 %vm333_vm0, %v1024_v15  ;;  %539 = vperm.xlu0 %1014, %v481_v22  }
  0x2e   : > { %964 = vmatprep.subr.bf16.mxu1 %v1097_v28 }
  0x2f   : > { %965 = vmatpush3.bf16.msra.mxu1 %v1032_v34 }
  0x30   : > { %554 = vperm.xlu1 %1015, %v484_v23   ;;  %966 = vmatprep.subr.bf16.mxu1 %v1097_v28 }
  0x31   : > { %549 = vperm.xlu0 %1014, %v483_v24  }
  0x33   : > { %967 = vmatpush3.bf16.msra.mxu1 %v1033_v35 }
  0x34   : > { %949 = vmatmul.mubr.msk.bf16.gmra.mxu0 %vm333_vm0, %v1025_v20  ;;  %564 = vperm.xlu1 %1015, %v486_v25  }
  0x35   : > { %559 = vperm.xlu0 %1014, %v485_v26  }
  0x93   : > { %v500_v36 = vpop.permute.xlu1 %499 }
  0x94   : > { %v490_v37 = vpop.permute.xlu0 %489 }
  0x97   : > { %v505_v38 = vpop.permute.xlu1 %504 }
  0x98   : > { %v495_v39 = vpop.permute.xlu0 %494 }
  0x9b   : > { %v515_v42 = vpop.permute.xlu1 %514 }
  0x9c   : > { %v510_v44 = vpop.permute.xlu0 %509 }
  0x9f   : > { %v525_v51 = vpop.permute.xlu1 %524 }
  0xa0   : > { %v520_v55 = vpop.permute.xlu0 %519 }
  0xa3   : > { %v535_v3 = vpop.permute.xlu1 %534 }
  0xa4   : > { %v530_v5 = vpop.permute.xlu0 %529 }
  0xa7   : > { %v545_v21 = vpop.permute.xlu1 %544 }
  0xa8   : > { %v540_v25 = vpop.permute.xlu0 %539 }
  0xdc   : > { %v938_v41 = vpop.f32.mrf.mxu0 }
  0xdd   : > { %v401_v43 = vadd.f32 %v938_v41, %v1254_v40 }
  0xde   : > { %v392_v45 = vpop.f32.mrf.mxu0 }
  0xdf   : > { %v393_v46 = vadd.f32 %v1254_v40, %v392_v45  ;;  %v457_v48 = vmax.f32 %v401_v43, 0.0  ;;  %v555_v43 = vpop.permute.xlu1 %554 }
  0xe0   : > { %v939_v47 = vpop.f32.mrf.mxu0 }
  0xe1   : > { %v404_v49 = vadd.f32 %v939_v47, %v1254_v40  ;;  %v455_v52 = vmax.f32 %v393_v46, 0.0  ;;  %v569_v57 = vmul.f32 %v500_v36, %v457_v48  ;;  %v550_v46 = vpop.permute.xlu0 %549 }
  0xe2   : > { %v395_v50 = vpop.f32.mrf.mxu0 }
  0xe3   : > { %v458_v53 = vmax.f32 %v404_v49, 0.0  ;;  %v396_v54 = vadd.f32 %v1254_v40, %v395_v50  ;;  %v567_v62 = vmul.f32 %v490_v37, %v455_v52 }
  0xe4   : > { %v942_v56 = vpop.f32.mrf.mxu0 }
  0xe5   : > { %v570_v58 = vmul.f32 %v505_v38, %v458_v53  ;;  %v456_v59 = vmax.f32 %v396_v54, 0.0  ;;  %v417_v60 = vadd.f32 %v942_v56, %v1254_v40 }
  0xe6   : > { %v408_v61 = vpop.f32.mrf.mxu0 }
  0xe7   : > { %v590_v63 = vadd.f32 %v570_v58, %v569_v57  ;;  %v568_v0 = vmul.f32 %v495_v39, %v456_v59  ;;  %v409_v1 = vadd.f32 %v1254_v40, %v408_v61  ;;  %v461_v7 = vmax.f32 %v417_v60, 0.0 }
  0xe8   : > { %v943_v2 = vpop.f32.mrf.mxu0 }
  0xe9   : > { %v583_v4 = vadd.f32 %v568_v0, %v567_v62  ;;  %v591_v6 = vrot.slane %v590_v63, 4  ;;  %v420_v8 = vadd.f32 %v943_v2, %v1254_v40  ;;  %v459_v11 = vmax.f32 %v409_v1, 0.0 }
  0xea   : > { %v411_v9 = vpop.f32.mrf.mxu0  ;;  %v573_v17 = vmul.f32 %v520_v55, %v461_v7 }
  0xeb   : > { %v584_v10 = vrot.slane %v583_v4, 4  ;;  %v412_v12 = vadd.f32 %v1254_v40, %v411_v9  ;;  %v462_v13 = vmax.f32 %v420_v8, 0.0  ;;  %v592_v16 = vadd.f32 %v591_v6, %v590_v63  ;;  %v565_v8 = vpop.permute.xlu1 %564  ;;  %v560_v9 = vpop.permute.xlu0 %559 }
  0xec   : > { %v946_v14 = vpop.f32.mrf.mxu0  ;;  %v571_v23 = vmul.f32 %v510_v44, %v459_v11 }
  0xed   : > { %v460_v15 = vmax.f32 %v412_v12, 0.0  ;;  %v574_v18 = vmul.f32 %v525_v51, %v462_v13  ;;  %v433_v19 = vadd.f32 %v946_v14, %v1254_v40  ;;  %v585_v22 = vadd.f32 %v584_v10, %v583_v4 }
  0xee   : > { %v424_v20 = vpop.f32.mrf.mxu0  ;;  %v593_v30 = vrot.slane %v592_v16, 2 }
  0xef   : > { %v572_v24 = vmul.f32 %v515_v42, %v460_v15  ;;  %v604_v26 = vadd.f32 %v574_v18, %v573_v17  ;;  %v425_v27 = vadd.f32 %v1254_v40, %v424_v20  ;;  %v465_v32 = vmax.f32 %v433_v19, 0.0 }
  0xf0   : > { %v947_v28 = vpop.f32.mrf.mxu0  ;;  %v586_v35 = vrot.slane %v585_v22, 2  ;;  %v594_v47 = vadd.f32 %v593_v30, %v592_v16 }
  0xf1   : > { %v597_v29 = vadd.f32 %v572_v24, %v571_v23  ;;  %v605_v31 = vrot.slane %v604_v26, 4  ;;  %v436_v33 = vadd.f32 %v947_v28, %v1254_v40  ;;  %v463_v37 = vmax.f32 %v425_v27, 0.0 }
  0xf2   : > { %v427_v34 = vpop.f32.mrf.mxu0  ;;  %v577_v48 = vmul.f32 %v540_v25, %v465_v32  ;;  %v587_v52 = vadd.f32 %v586_v35, %v585_v22  ;;  %v595_v2 = vrot.slane %v594_v47, 1 }
  0xf3   : > { %v598_v36 = vrot.slane %v597_v29, 4  ;;  %v428_v38 = vadd.f32 %v1254_v40, %v427_v34  ;;  %v606_v39 = vadd.f32 %v605_v31, %v604_v26  ;;  %v466_v41 = vmax.f32 %v436_v33, 0.0 }
  0xf4   : > { %v950_v42 = vpop.f32.mrf.mxu0  ;;  %v575_v54 = vmul.f32 %v530_v5, %v463_v37  ;;  %v588_v4 = vrot.slane %v587_v52, 1 }
  0xf5   : > { %v599_v44 = vadd.f32 %v598_v36, %v597_v29  ;;  %v464_v45 = vmax.f32 %v428_v38, 0.0  ;;  %v578_v49 = vmul.f32 %v545_v21, %v466_v41  ;;  %v449_v50 = vadd.f32 %v950_v42, %v1254_v40 }
  0xf6   : > { %v440_v51 = vpop.f32.mrf.mxu0  ;;  %v607_v56 = vrot.slane %v606_v39, 2  ;;  %v589_v18 = vadd.f32 %v588_v4, %v587_v52  ;;  %v596_v21 = vadd.f32 %v595_v2, %v594_v47 }
  0xf7   : > { %v600_v53 = vrot.slane %v599_v44, 2  ;;  %v576_v55 = vmul.f32 %v535_v3, %v464_v45  ;;  %v618_v57 = vadd.f32 %v578_v49, %v577_v48  ;;  %v441_v58 = vadd.f32 %v1254_v40, %v440_v51 }
  0xf8   : > { %v951_v59 = vpop.f32.mrf.mxu0  ;;  %v469_v62 = vmax.f32 %v449_v50, 0.0  ;;  %v608_v12 = vadd.f32 %v607_v56, %v606_v39  ;;  %v639_v30 = vpack.c.bf16 %v589_v18, %v589_v18  ;;  %v640_v32 = vpack.c.bf16 %v596_v21, %v596_v21 }
  0xf9   : > { %v601_v60 = vadd.f32 %v600_v53, %v599_v44  ;;  %v611_v61 = vadd.f32 %v576_v55, %v575_v54  ;;  %v452_v63 = vadd.f32 %v951_v59, %v1254_v40  ;;  %v619_v0 = vrot.slane %v618_v57, 4 }
  0xfa   : > { %v443_v1 = vpop.f32.mrf.mxu0  ;;  %v467_v10 = vmax.f32 %v441_v58, 0.0  ;;  %v581_v14 = vmul.f32 %v560_v9, %v469_v62  ;;  %v609_v25 = vrot.slane %v608_v12, 1  ;;  %v671_v41 = vunpack.c.l.b16 %v639_v30 }
  0xfb   : > { %v612_v6 = vrot.slane %v611_v61, 4  ;;  %v470_v7 = vmax.f32 %v452_v63, 0.0  ;;  %v602_v5 = vrot.slane %v601_v60, 1  ;;  %v620_v3 = vadd.f32 %v619_v0, %v618_v57 }
  0xfc   : > { %v444_v11 = vadd.f32 %v1254_v40, %v443_v1  ;;  %v579_v23 = vmul.f32 %v550_v46, %v467_v10  ;;  %v610_v35 = vadd.f32 %v609_v25, %v608_v12  ;;  %v672_v46 = vunpack.c.l.b16 %v640_v32 }
  0xfd   : > { %v613_v13 = vadd.f32 %v612_v6, %v611_v61  ;;  %v582_v15 = vmul.f32 %v565_v8, %v470_v7  ;;  %v621_v16 = vrot.slane %v620_v3, 2  ;;  %v603_v22 = vadd.f32 %v602_v5, %v601_v60 }
  0xfe   : > { %v468_v17 = vmax.f32 %v444_v11, 0.0  ;;  %v642_v47 = vpack.c.bf16 %v610_v35, %v610_v35  ;;  %v680_v51 = vsel %vm679_vm2, %v672_v46, %v671_v41 }
  0xff   : > { %v614_v19 = vrot.slane %v613_v13, 2  ;;  %v632_v20 = vadd.f32 %v582_v15, %v581_v14  ;;  %v622_v26 = vadd.f32 %v621_v16, %v620_v3  ;;  %v641_v33 = vpack.c.bf16 %v603_v22, %v603_v22 }
 0x100   : > { %v580_v24 = vmul.f32 %v555_v43, %v468_v17  ;;  %v674_v56 = vunpack.c.l.b16 %v642_v47 }
 0x101   : > { %v615_v27 = vadd.f32 %v614_v19, %v613_v13  ;;  %v633_v28 = vrot.slane %v632_v20, 4  ;;  %v623_v36 = vrot.slane %v622_v26, 1  ;;  %v673_v43 = vunpack.c.l.b16 %v641_v33 }
 0x102   : > { %v625_v29 = vadd.f32 %v580_v24, %v579_v23 }
 0x103   : > { %v616_v40 = vrot.slane %v615_v27, 1  ;;  %v634_v31 = vadd.f32 %v633_v28, %v632_v20  ;;  %v624_v48 = vadd.f32 %v623_v36, %v622_v26  ;;  %v682_v55 = vsel %vm681_vm3, %v673_v43, %v680_v51 }
 0x104   : > { %v626_v34 = vrot.slane %v625_v29, 4  ;;  %v684_v60 = vsel %vm683_vm4, %v674_v56, %v682_v55 }
 0x105   : > { %v617_v37 = vadd.f32 %v616_v40, %v615_v27  ;;  %v635_v38 = vrot.slane %v634_v31, 2  ;;  %v644_v57 = vpack.c.bf16 %v624_v48, %v624_v48 }
 0x106   : > { %v627_v39 = vadd.f32 %v626_v34, %v625_v29 }
 0x107   : > { %v636_v42 = vadd.f32 %v635_v38, %v634_v31  ;;  %v643_v44 = vpack.c.bf16 %v617_v37, %v617_v37  ;;  %v676_v63 = vunpack.c.l.b16 %v644_v57 }
 0x108   : > { %v628_v45 = vrot.slane %v627_v39, 2 }
 0x109   : > { %v637_v49 = vrot.slane %v636_v42, 1  ;;  %v675_v53 = vunpack.c.l.b16 %v643_v44 }
 0x10a   : > { %v629_v50 = vadd.f32 %v628_v45, %v627_v39 }
 0x10b   : > { %v638_v52 = vadd.f32 %v637_v49, %v636_v42  ;;  %v686_v62 = vsel %vm685_vm5, %v675_v53, %v684_v60 }
 0x10c   : > { %v630_v54 = vrot.slane %v629_v50, 1  ;;  %v688_v2 = vsel %vm687_vm6, %v676_v63, %v686_v62 }
 0x10d   : > { %v646_v59 = vpack.c.bf16 %v638_v52, %v638_v52 }
 0x10e   : > { %v631_v58 = vadd.f32 %v630_v54, %v629_v50 }
 0x10f   : > { %v678_v1 = vunpack.c.l.b16 %v646_v59 }
 0x110   : > { %v645_v61 = vpack.c.bf16 %v631_v58, %v631_v58 }
 0x112   : > { %v677_v0 = vunpack.c.l.b16 %v645_v61 }
 0x114   : > { %v690_v4 = vsel %vm689_vm7, %v677_v0, %v688_v2 }
 0x115   : > { %v692_v6 = vsel %vm691_vm8, %v678_v1, %v690_v4 }
 0x116   : > { %v693_v7 = vpack.c.b16 %v692_v6, %v692_v6 }
 0x118   : > { %969 = vmatmul.mubr.bf16.vlgmr.msra.gmra.mxu1 %v693_v7 }
 0x1d8   : > { %v777_v8 = vpop.f32.mrf.mxu1 }
 0x1d9   : > { %783 = vst [vmem:[%s238_s6] sm:$0xff] %v777_v8 }
 0x1da   : > { %v970_v9 = vpop.f32.mrf.mxu1 }
 0x1db   : > { %1047 = shalt.err (!%p1044_p3)
}
 0x1dc   : > { %s1048_s16 = scalar_lea.hbm %s1279_s11, 128  ;;  %s1052_s25 = scalar_lea.hbm %s1323_s5, 256 }
 0x1dd   : > { %p1049_p4 = scmp.ne.s32.totalorder %s1279_s11, %s1048_s16  ;;  %p1053_p9 = scmp.lt.s32.totalorder %s1279_s11, %s1323_s5 }
 0x1de   : > { %p1054_p10 = scmp.lt.s32.totalorder %s1052_s25, %s1048_s16 }
 0x1df   : > { %p1050_p7 = pnand %p1049_p4, %p1168_p5 }
 0x1e0   : > { %p1055_p11 = por %p1054_p10, %p1053_p9 }
 0x1e1   : > { %p1051_p8 = pneg %p1050_p7 }
 0x1e3   : > { %p1056_p12 = pnand %p1055_p11, %p1051_p8 }
 0x1e5   : > { %1059 = shalt.err (!%p1056_p12)
}
 0x1e6   : > { %972 = dma.vmem_to_hbm [thread:$0]  (%p1168_p5), %s1274_s7, 128, %s1279_s11, %s785_s12   ;;  %v780_v5 = vpop.f32.mrf.mxu1 }
 0x1e8   : > { %v971_v3 = vpop.f32.mrf.mxu1 }
 0x1e9 PF: > { %p978_p13 = scmp.ge.s32.totalorder %s1094_s21, 2  ;;  %s810_s6 = sand.u32 1, %s1082_s18  }
 0x1ea   : > { %s811_s8 = scalar_lea.sflag [#allocation3], %s810_s6 }
 0x1eb   : > { %p975_p0 = pnand %p978_p13, %p1172_p6 }
 0x1ed   : > { %p976_p1 = pneg %p975_p0 }
 0x1ef   : > { %1077 = dma.done.wait (%p976_p1), %s811_s8, 128  }
 0x1f0   : > { %1079 = vsyncadd (%p976_p1), %s811_s8, 4294967168  ;;  %p15_p5 = scmp.ge.s32.totalorder %s1155_s24, 4   ;;  %s1326_s18 = smov %s1086_s19 }
 0x1f1   : > { %s1327_s19 = smov %s1090_s20  ;;  %s1328_s20 = smov %s1166_s27 }
 0x1f2   : > { %s1329_s21 = smov %s1155_s24  ;;  %17 = sbr.rel (!%p15_p5) target bundleno = 3 (0x3), region = 78 }
 0x1f7   :  { %816 = vsyncpa [#allocation3], 1 }
 0x1f8   :  { %818 = vsyncpa [#allocation3 + $0x1], 1 }

</bundles_post_ra>
